<compile_context>
chip_gen: v5e
topology: v5e:2x2
jax: 0.10.0
libtpu: 0.0.40
codegen_flags: <defaults>
</compile_context>

<pallas_src>
import jax
import jax.numpy as jnp
from jax.experimental import pallas as pl
from jax.experimental.pallas import tpu as pltpu


def lftm_kernel(x_ref, pool_ref, up_ref,
                proj_ref, xconv_ref, exp_ref,
                fc1x_ref, fc1b_ref, fc2x_ref, fc2b_ref,
                ocx_ref, ocb_ref, out_ref):
    f32 = jnp.float32
    bb, C, N = x_ref.shape
    P = pool_ref.shape[1]
    inv_p = 1.0 / P
    mm = x_ref.dtype                  # MXU operand dtype (f32 or bf16)

    # Hoist all weight / helper-matrix loads out of the per-image loop.
    pool_m = pool_ref[...]            # (N, P)  0.25-scaled pooling matrix
    up_m = up_ref[...]                # (P, N)  nearest-neighbour upsample matrix
    proj_w = proj_ref[...]            # (C/4, C)
    xconv_w = xconv_ref[...]          # (C/4, C/4)
    exp_w = exp_ref[...]              # (4, C/4)
    fc1x_w = fc1x_ref[...]            # (mid, C)   SE fc1, x-channel part
    fc1b_w = fc1b_ref[...]            # (mid, 4)   SE fc1, branch part
    fc2x_w = fc2x_ref[...]            # (C, mid)
    fc2b_w = fc2b_ref[...]            # (4, mid)
    ocx_w = ocx_ref[...]              # (C, C)     oconv, x-channel part
    ocb_w = ocb_ref[...]              # (C, 4)     oconv, branch part

    for b in range(bb):               # static, unrolled; bb is small
        x = x_ref[b]                  # (C, N)  spatial on lanes

        # --- AvgPool2d(2, 2) as one matmul with the 0/0.25 pooling matrix ---
        pooled = jnp.dot(x, pool_m, preferred_element_type=f32)       # (C, P)

        # --- proj -> relu -> xconv -> relu -> expendc (1x1 convs == matmuls) ---
        h = jnp.maximum(jnp.dot(proj_w, pooled.astype(mm),
                                preferred_element_type=f32), 0.0)
        h = jnp.maximum(jnp.dot(xconv_w, h.astype(mm),
                                preferred_element_type=f32), 0.0)
        br = jnp.dot(exp_w, h.astype(mm),
                     preferred_element_type=f32)                       # (4, P)

        # --- SELayer on cat([x, upsample(br)]): global mean + MLP + sigmoid ---
        # mean over H*W of x == mean over P of pooled (exact, non-overlapping
        # 2x2 average); mean over H*W of nearest-upsampled br == mean of br.
        mean_x = jnp.sum(pooled, axis=1, keepdims=True) * inv_p        # (C, 1)
        mean_b = jnp.sum(br, axis=1, keepdims=True) * inv_p            # (4, 1)
        s = jnp.maximum(
            jnp.dot(fc1x_w, mean_x, preferred_element_type=f32)
            + jnp.dot(fc1b_w, mean_b, preferred_element_type=f32), 0.0)
        y_x = jax.nn.sigmoid(jnp.dot(fc2x_w, s, preferred_element_type=f32))  # (C, 1)
        y_b = jax.nn.sigmoid(jnp.dot(fc2b_w, s, preferred_element_type=f32))  # (4, 1)

        # --- oconv on the SE-gated concat, split into x part + branch part ---
        # Gates applied once per image (lane broadcast) on the matmul operands.
        x_g = (x * y_x).astype(mm)                                     # (C, N)
        br_g = (br * y_b).astype(mm)                                   # (4, P)

        out_x = jnp.dot(ocx_w, x_g, preferred_element_type=f32)        # (C, N)
        # Upsample the (tiny) 4-channel branch first, then apply oconv_b at
        # full resolution: 4*P*N + C*4*N MACs instead of C*4*P + C*P*N.
        br_up = jnp.dot(br_g, up_m, preferred_element_type=f32)        # (4, N)
        out_b = jnp.dot(ocb_w, br_up.astype(mm),
                        preferred_element_type=f32)                    # (C, N)

        # Single fused, lane-dense store for the whole image.
        out_ref[b] = (out_x + out_b).astype(out_ref.dtype)


def _full_spec(w):
    nd = w.ndim
    return pl.BlockSpec(w.shape, lambda i, _nd=nd: (0,) * _nd)


def lftm_forward(x_nchw, params, *, block_batch=None, mxu_dtype=None):
    B, C, H, W = x_nchw.shape
    assert H % 2 == 0 and W % 2 == 0
    Hh, Wh = H // 2, W // 2
    P, N = Hh * Wh, H * W

    # NCHW -> (B, C, H*W): contiguous reshape, no HBM transpose.
    x_flat = x_nchw.reshape(B, C, N)

    # Structured pooling / upsample matrices (built once, tiny).
    n = jnp.arange(N, dtype=jnp.int32)
    pool_idx = (n // (2 * W)) * Wh + (n % W) // 2
    sel = pool_idx[:, None] == jnp.arange(P, dtype=jnp.int32)[None, :]
    pool_m = sel.astype(jnp.float32) * 0.25        # (N, P): x @ pool_m == 2x2 avg-pool
    up_m = jnp.transpose(sel).astype(jnp.float32)  # (P, N): z @ up_m == nearest x2 upsample

    weights = dict(params)
    if mxu_dtype is not None:
        # bf16 (or other) MXU operands for the large matmuls; SE MLP stays f32.
        x_flat = x_flat.astype(mxu_dtype)
        pool_m = pool_m.astype(mxu_dtype)
        up_m = up_m.astype(mxu_dtype)
        for k in ("proj", "xconv", "expendc", "oconv_x", "oconv_b"):
            weights[k] = weights[k].astype(mxu_dtype)

    w_list = [pool_m, up_m,
              weights["proj"], weights["xconv"], weights["expendc"],
              weights["fc1_x"], weights["fc1_b"],
              weights["fc2_x"], weights["fc2_b"],
              weights["oconv_x"], weights["oconv_b"]]

    # Batch blocking: amortize per-grid-step overhead, but keep >=2 grid steps so
    # the parallel batch axis can be split across TensorCores (v7x megacore).
    if block_batch is None:
        bb = 1
        for cand in (8, 4, 2):
            if B % cand == 0 and B // cand >= 2:
                bb = cand
                break
    else:
        bb = block_batch
    assert B % bb == 0

    out_flat = pl.pallas_call(
        lftm_kernel,
        out_shape=jax.ShapeDtypeStruct((B, C, N), x_flat.dtype),
        grid=(B // bb,),
        in_specs=[pl.BlockSpec((bb, C, N), lambda i: (i, 0, 0))]
                 + [_full_spec(w) for w in w_list],
        out_specs=pl.BlockSpec((bb, C, N), lambda i: (i, 0, 0)),
        compiler_params=pltpu.CompilerParams(
            dimension_semantics=("parallel",)),
    )(x_flat, *w_list)

    return out_flat.reshape(B, C, H, W)


def init_params(key, channel, reduction=4):
    """Deterministic synthetic weights, stored in PyTorch (out, in) layout.

    fc1/fc2/oconv are additionally split into the x-channel part and the 4
    branch channels (concat order [x, upsample(branch)]).
    """
    c4 = channel // reduction
    se_c = channel + 4
    se_mid = se_c // reduction
    ks = jax.random.split(key, 6)

    def w(k, shape):
        return jax.random.normal(k, shape, jnp.float32) * 0.1

    proj = w(ks[0], (c4, channel))
    xconv = w(ks[1], (c4, c4))
    expendc = w(ks[2], (4, c4))
    fc1 = w(ks[3], (se_mid, se_c))
    fc2 = w(ks[4], (se_c, se_mid))
    oconv = w(ks[5], (channel, se_c))
    return dict(
        proj=proj, xconv=xconv, expendc=expendc, fc1=fc1, fc2=fc2, oconv=oconv,
        fc1_x=fc1[:, :channel], fc1_b=fc1[:, channel:],
        fc2_x=fc2[:channel], fc2_b=fc2[channel:],
        oconv_x=oconv[:, :channel], oconv_b=oconv[:, channel:],
    )


def lftm_reference(x_nchw, params):
    """Pure-JAX reference of the PyTorch LFTM forward (verification only)."""
    x = jnp.transpose(x_nchw, (0, 2, 3, 1))                 # NHWC
    B, H, W, C = x.shape
    xp = x.reshape(B, H // 2, 2, W // 2, 2, C).mean(axis=(2, 4))
    h = jax.nn.relu(xp @ params["proj"].T)
    h = jax.nn.relu(h @ params["xconv"].T)
    br = h @ params["expendc"].T                            # (B, H/2, W/2, 4)
    up = jnp.repeat(jnp.repeat(br, 2, axis=1), 2, axis=2)   # nearest upsample x2
    cat = jnp.concatenate([x, up], axis=-1)                 # (B, H, W, C+4)
    s = cat.mean(axis=(1, 2))
    y = jax.nn.sigmoid(jax.nn.relu(s @ params["fc1"].T) @ params["fc2"].T)
    out = (cat * y[:, None, None, :]) @ params["oconv"].T   # (B, H, W, C)
    return jnp.transpose(out, (0, 3, 1, 2))                 # NCHW


if __name__ == "__main__":
    key = jax.random.PRNGKey(0)
    kx, kp = jax.random.split(key)

    B, C, H, W = 4, 8, 16, 16            # channel=8, reduction=4 -> C//4 = 2
    x = jax.random.normal(kx, (B, C, H, W), jnp.float32)
    params = init_params(kp, C, reduction=4)

    ref = lftm_reference(x, params)

    # f32 path (strict check); block_batch heuristic picks 2 images per grid step.
    out = jax.block_until_ready(lftm_forward(x, params))
    assert out.shape == (B, C, H, W)
    if not jnp.allclose(out, ref, atol=1e-4, rtol=1e-4):
        raise AssertionError("Pallas LFTM (f32) output does not match JAX reference")

    # bf16 MXU-operand path (v6e/v7x optimization); f32 accumulation, loose tolerance.
    out_bf16 = jax.block_until_ready(
        lftm_forward(x, params, mxu_dtype=jnp.bfloat16))
    if not jnp.allclose(out_bf16.astype(jnp.float32), ref, atol=1e-1, rtol=1e-1):
        raise AssertionError("Pallas LFTM (bf16) output does not match JAX reference")

    print("KERNEL_OK")
</pallas_src>

<mosaic_0001>
module attributes {stable_mosaic.version = 11 : i64} {
  func.func @lftm_kernel(%arg0: i32, %arg1: memref<2x8x256xf32, #tpu.memory_space<vmem>>, %arg2: memref<256x64xf32, #tpu.memory_space<vmem>>, %arg3: memref<64x256xf32, #tpu.memory_space<vmem>>, %arg4: memref<2x8xf32, #tpu.memory_space<vmem>>, %arg5: memref<2x2xf32, #tpu.memory_space<vmem>>, %arg6: memref<4x2xf32, #tpu.memory_space<vmem>>, %arg7: memref<3x8xf32, #tpu.memory_space<vmem>>, %arg8: memref<3x4xf32, #tpu.memory_space<vmem>>, %arg9: memref<8x3xf32, #tpu.memory_space<vmem>>, %arg10: memref<4x3xf32, #tpu.memory_space<vmem>>, %arg11: memref<8x8xf32, #tpu.memory_space<vmem>>, %arg12: memref<8x4xf32, #tpu.memory_space<vmem>>, %arg13: memref<2x8x256xf32, #tpu.memory_space<vmem>>) attributes {dimension_semantics = [#tpu.dimension_semantics<parallel>], iteration_bounds = array<i64: 2>, scalar_prefetch = 0 : i64, scratch_operands = 0 : i64, tpu.core_type = #tpu.core_type<tc>, window_params = [{transform_indices = @transform_0, window_bounds = array<i64: 2, 8, 256>}, {pipeline_mode = #tpu.pipeline_mode<synchronous>, transform_indices = @transform_1, window_bounds = array<i64: 256, 64>}, {pipeline_mode = #tpu.pipeline_mode<synchronous>, transform_indices = @transform_2, window_bounds = array<i64: 64, 256>}, {pipeline_mode = #tpu.pipeline_mode<synchronous>, transform_indices = @transform_3, window_bounds = array<i64: 2, 8>}, {pipeline_mode = #tpu.pipeline_mode<synchronous>, transform_indices = @transform_4, window_bounds = array<i64: 2, 2>}, {pipeline_mode = #tpu.pipeline_mode<synchronous>, transform_indices = @transform_5, window_bounds = array<i64: 4, 2>}, {pipeline_mode = #tpu.pipeline_mode<synchronous>, transform_indices = @transform_6, window_bounds = array<i64: 3, 8>}, {pipeline_mode = #tpu.pipeline_mode<synchronous>, transform_indices = @transform_7, window_bounds = array<i64: 3, 4>}, {pipeline_mode = #tpu.pipeline_mode<synchronous>, transform_indices = @transform_8, window_bounds = array<i64: 8, 3>}, {pipeline_mode = #tpu.pipeline_mode<synchronous>, transform_indices = @transform_9, window_bounds = array<i64: 4, 3>}, {pipeline_mode = #tpu.pipeline_mode<synchronous>, transform_indices = @transform_10, window_bounds = array<i64: 8, 8>}, {pipeline_mode = #tpu.pipeline_mode<synchronous>, transform_indices = @transform_11, window_bounds = array<i64: 8, 4>}, {transform_indices = @transform_12, window_bounds = array<i64: 2, 8, 256>}]} {
    %c0 = arith.constant 0 : index
    %c0_0 = arith.constant 0 : index
    %0 = vector.load %arg2[%c0, %c0_0] : memref<256x64xf32, #tpu.memory_space<vmem>>, vector<256x64xf32>
    %c0_1 = arith.constant 0 : index
    %c0_2 = arith.constant 0 : index
    %1 = vector.load %arg3[%c0_1, %c0_2] : memref<64x256xf32, #tpu.memory_space<vmem>>, vector<64x256xf32>
    %c0_3 = arith.constant 0 : index
    %c0_4 = arith.constant 0 : index
    %2 = vector.load %arg4[%c0_3, %c0_4] : memref<2x8xf32, #tpu.memory_space<vmem>>, vector<2x8xf32>
    %c0_5 = arith.constant 0 : index
    %c0_6 = arith.constant 0 : index
    %3 = vector.load %arg5[%c0_5, %c0_6] : memref<2x2xf32, #tpu.memory_space<vmem>>, vector<2x2xf32>
    %c0_7 = arith.constant 0 : index
    %c0_8 = arith.constant 0 : index
    %4 = vector.load %arg6[%c0_7, %c0_8] : memref<4x2xf32, #tpu.memory_space<vmem>>, vector<4x2xf32>
    %c0_9 = arith.constant 0 : index
    %c0_10 = arith.constant 0 : index
    %5 = vector.load %arg7[%c0_9, %c0_10] : memref<3x8xf32, #tpu.memory_space<vmem>>, vector<3x8xf32>
    %c0_11 = arith.constant 0 : index
    %c0_12 = arith.constant 0 : index
    %6 = vector.load %arg8[%c0_11, %c0_12] : memref<3x4xf32, #tpu.memory_space<vmem>>, vector<3x4xf32>
    %c0_13 = arith.constant 0 : index
    %c0_14 = arith.constant 0 : index
    %7 = vector.load %arg9[%c0_13, %c0_14] : memref<8x3xf32, #tpu.memory_space<vmem>>, vector<8x3xf32>
    %c0_15 = arith.constant 0 : index
    %c0_16 = arith.constant 0 : index
    %8 = vector.load %arg10[%c0_15, %c0_16] : memref<4x3xf32, #tpu.memory_space<vmem>>, vector<4x3xf32>
    %c0_17 = arith.constant 0 : index
    %c0_18 = arith.constant 0 : index
    %9 = vector.load %arg11[%c0_17, %c0_18] : memref<8x8xf32, #tpu.memory_space<vmem>>, vector<8x8xf32>
    %c0_19 = arith.constant 0 : index
    %c0_20 = arith.constant 0 : index
    %10 = vector.load %arg12[%c0_19, %c0_20] : memref<8x4xf32, #tpu.memory_space<vmem>>, vector<8x4xf32>
    %c0_21 = arith.constant 0 : index
    %c0_22 = arith.constant 0 : index
    %c0_23 = arith.constant 0 : index
    %11 = vector.load %arg1[%c0_21, %c0_22, %c0_23] : memref<2x8x256xf32, #tpu.memory_space<vmem>>, vector<1x8x256xf32>
    %12 = vector.shape_cast %11 : vector<1x8x256xf32> to vector<8x256xf32>
    %cst = arith.constant dense<0.000000e+00> : vector<8x64xf32>
    %13 = tpu.matmul %12, %0, %cst {dimension_numbers = #tpu.dot_dimension_numbers<[1], [0], [0], [1], [0, 0, 1, 1], [], []>} : vector<8x256xf32>, vector<256x64xf32>, vector<8x64xf32> -> vector<8x64xf32>
    %cst_24 = arith.constant dense<0.000000e+00> : vector<2x64xf32>
    %14 = tpu.matmul %2, %13, %cst_24 {dimension_numbers = #tpu.dot_dimension_numbers<[1], [0], [0], [1], [0, 0, 1, 1], [], []>} : vector<2x8xf32>, vector<8x64xf32>, vector<2x64xf32> -> vector<2x64xf32>
    %cst_25 = arith.constant 0.000000e+00 : f32
    %15 = vector.broadcast %cst_25 : f32 to vector<2x64xf32>
    %16 = arith.maximumf %14, %15 : vector<2x64xf32>
    %cst_26 = arith.constant dense<0.000000e+00> : vector<2x64xf32>
    %17 = tpu.matmul %3, %16, %cst_26 {dimension_numbers = #tpu.dot_dimension_numbers<[1], [0], [0], [1], [0, 0, 1, 1], [], []>} : vector<2x2xf32>, vector<2x64xf32>, vector<2x64xf32> -> vector<2x64xf32>
    %cst_27 = arith.constant 0.000000e+00 : f32
    %18 = vector.broadcast %cst_27 : f32 to vector<2x64xf32>
    %19 = arith.maximumf %17, %18 : vector<2x64xf32>
    %cst_28 = arith.constant dense<0.000000e+00> : vector<4x64xf32>
    %20 = tpu.matmul %4, %19, %cst_28 {dimension_numbers = #tpu.dot_dimension_numbers<[1], [0], [0], [1], [0, 0, 1, 1], [], []>} : vector<4x2xf32>, vector<2x64xf32>, vector<4x64xf32> -> vector<4x64xf32>
    %cst_29 = arith.constant dense<0.000000e+00> : vector<8xf32>
    %21 = vector.multi_reduction <add>, %13, %cst_29 [1] : vector<8x64xf32> to vector<8xf32>
    %22 = vector.shape_cast %21 : vector<8xf32> to vector<8x1xf32>
    %cst_30 = arith.constant 1.562500e-02 : f32
    %23 = vector.broadcast %cst_30 : f32 to vector<8x1xf32>
    %24 = arith.mulf %22, %23 : vector<8x1xf32>
    %cst_31 = arith.constant dense<0.000000e+00> : vector<4xf32>
    %25 = vector.multi_reduction <add>, %20, %cst_31 [1] : vector<4x64xf32> to vector<4xf32>
    %26 = vector.shape_cast %25 : vector<4xf32> to vector<4x1xf32>
    %cst_32 = arith.constant 1.562500e-02 : f32
    %27 = vector.broadcast %cst_32 : f32 to vector<4x1xf32>
    %28 = arith.mulf %26, %27 : vector<4x1xf32>
    %cst_33 = arith.constant dense<0.000000e+00> : vector<3x1xf32>
    %29 = tpu.matmul %5, %24, %cst_33 {dimension_numbers = #tpu.dot_dimension_numbers<[1], [0], [0], [1], [0, 0, 1, 1], [], []>} : vector<3x8xf32>, vector<8x1xf32>, vector<3x1xf32> -> vector<3x1xf32>
    %cst_34 = arith.constant dense<0.000000e+00> : vector<3x1xf32>
    %30 = tpu.matmul %6, %28, %cst_34 {dimension_numbers = #tpu.dot_dimension_numbers<[1], [0], [0], [1], [0, 0, 1, 1], [], []>} : vector<3x4xf32>, vector<4x1xf32>, vector<3x1xf32> -> vector<3x1xf32>
    %31 = arith.addf %29, %30 : vector<3x1xf32>
    %cst_35 = arith.constant 0.000000e+00 : f32
    %32 = vector.broadcast %cst_35 : f32 to vector<3x1xf32>
    %33 = arith.maximumf %31, %32 : vector<3x1xf32>
    %cst_36 = arith.constant dense<0.000000e+00> : vector<8x1xf32>
    %34 = tpu.matmul %7, %33, %cst_36 {dimension_numbers = #tpu.dot_dimension_numbers<[1], [0], [0], [1], [0, 0, 1, 1], [], []>} : vector<8x3xf32>, vector<3x1xf32>, vector<8x1xf32> -> vector<8x1xf32>
    %35 = arith.negf %34 : vector<8x1xf32>
    %36 = math.exp %35 : vector<8x1xf32>
    %cst_37 = arith.constant 1.000000e+00 : f32
    %37 = vector.broadcast %cst_37 : f32 to vector<8x1xf32>
    %38 = arith.addf %37, %36 : vector<8x1xf32>
    %39 = arith.divf %37, %38 : vector<8x1xf32>
    %cst_38 = arith.constant dense<0.000000e+00> : vector<4x1xf32>
    %40 = tpu.matmul %8, %33, %cst_38 {dimension_numbers = #tpu.dot_dimension_numbers<[1], [0], [0], [1], [0, 0, 1, 1], [], []>} : vector<4x3xf32>, vector<3x1xf32>, vector<4x1xf32> -> vector<4x1xf32>
    %41 = arith.negf %40 : vector<4x1xf32>
    %42 = math.exp %41 : vector<4x1xf32>
    %cst_39 = arith.constant 1.000000e+00 : f32
    %43 = vector.broadcast %cst_39 : f32 to vector<4x1xf32>
    %44 = arith.addf %43, %42 : vector<4x1xf32>
    %45 = arith.divf %43, %44 : vector<4x1xf32>
    %46 = vector.broadcast %39 : vector<8x1xf32> to vector<8x256xf32>
    %47 = arith.mulf %12, %46 : vector<8x256xf32>
    %48 = vector.broadcast %45 : vector<4x1xf32> to vector<4x64xf32>
    %49 = arith.mulf %20, %48 : vector<4x64xf32>
    %cst_40 = arith.constant dense<0.000000e+00> : vector<8x256xf32>
    %50 = tpu.matmul %9, %47, %cst_40 {dimension_numbers = #tpu.dot_dimension_numbers<[1], [0], [0], [1], [0, 0, 1, 1], [], []>} : vector<8x8xf32>, vector<8x256xf32>, vector<8x256xf32> -> vector<8x256xf32>
    %cst_41 = arith.constant dense<0.000000e+00> : vector<4x256xf32>
    %51 = tpu.matmul %49, %1, %cst_41 {dimension_numbers = #tpu.dot_dimension_numbers<[1], [0], [0], [1], [0, 0, 1, 1], [], []>} : vector<4x64xf32>, vector<64x256xf32>, vector<4x256xf32> -> vector<4x256xf32>
    %cst_42 = arith.constant dense<0.000000e+00> : vector<8x256xf32>
    %52 = tpu.matmul %10, %51, %cst_42 {dimension_numbers = #tpu.dot_dimension_numbers<[1], [0], [0], [1], [0, 0, 1, 1], [], []>} : vector<8x4xf32>, vector<4x256xf32>, vector<8x256xf32> -> vector<8x256xf32>
    %53 = arith.addf %50, %52 : vector<8x256xf32>
    %c0_43 = arith.constant 0 : index
    %c0_44 = arith.constant 0 : index
    %c0_45 = arith.constant 0 : index
    %54 = vector.load %arg13[%c0_43, %c0_44, %c0_45] : memref<2x8x256xf32, #tpu.memory_space<vmem>>, vector<1x8x256xf32>
    %55 = vector.shape_cast %54 : vector<1x8x256xf32> to vector<8x256xf32>
    %56 = vector.shape_cast %53 : vector<8x256xf32> to vector<1x8x256xf32>
    tpu.vector_store %arg13[%c0_43, %c0_44, %c0_45], %56 {strides = array<i32>} : memref<2x8x256xf32, #tpu.memory_space<vmem>>, vector<1x8x256xf32>,
    %c1 = arith.constant 1 : index
    %c0_46 = arith.constant 0 : index
    %c0_47 = arith.constant 0 : index
    %57 = vector.load %arg1[%c1, %c0_46, %c0_47] : memref<2x8x256xf32, #tpu.memory_space<vmem>>, vector<1x8x256xf32>
    %58 = vector.shape_cast %57 : vector<1x8x256xf32> to vector<8x256xf32>
    %cst_48 = arith.constant dense<0.000000e+00> : vector<8x64xf32>
    %59 = tpu.matmul %58, %0, %cst_48 {dimension_numbers = #tpu.dot_dimension_numbers<[1], [0], [0], [1], [0, 0, 1, 1], [], []>} : vector<8x256xf32>, vector<256x64xf32>, vector<8x64xf32> -> vector<8x64xf32>
    %cst_49 = arith.constant dense<0.000000e+00> : vector<2x64xf32>
    %60 = tpu.matmul %2, %59, %cst_49 {dimension_numbers = #tpu.dot_dimension_numbers<[1], [0], [0], [1], [0, 0, 1, 1], [], []>} : vector<2x8xf32>, vector<8x64xf32>, vector<2x64xf32> -> vector<2x64xf32>
    %cst_50 = arith.constant 0.000000e+00 : f32
    %61 = vector.broadcast %cst_50 : f32 to vector<2x64xf32>
    %62 = arith.maximumf %60, %61 : vector<2x64xf32>
    %cst_51 = arith.constant dense<0.000000e+00> : vector<2x64xf32>
    %63 = tpu.matmul %3, %62, %cst_51 {dimension_numbers = #tpu.dot_dimension_numbers<[1], [0], [0], [1], [0, 0, 1, 1], [], []>} : vector<2x2xf32>, vector<2x64xf32>, vector<2x64xf32> -> vector<2x64xf32>
    %cst_52 = arith.constant 0.000000e+00 : f32
    %64 = vector.broadcast %cst_52 : f32 to vector<2x64xf32>
    %65 = arith.maximumf %63, %64 : vector<2x64xf32>
    %cst_53 = arith.constant dense<0.000000e+00> : vector<4x64xf32>
    %66 = tpu.matmul %4, %65, %cst_53 {dimension_numbers = #tpu.dot_dimension_numbers<[1], [0], [0], [1], [0, 0, 1, 1], [], []>} : vector<4x2xf32>, vector<2x64xf32>, vector<4x64xf32> -> vector<4x64xf32>
    %cst_54 = arith.constant dense<0.000000e+00> : vector<8xf32>
    %67 = vector.multi_reduction <add>, %59, %cst_54 [1] : vector<8x64xf32> to vector<8xf32>
    %68 = vector.shape_cast %67 : vector<8xf32> to vector<8x1xf32>
    %cst_55 = arith.constant 1.562500e-02 : f32
    %69 = vector.broadcast %cst_55 : f32 to vector<8x1xf32>
    %70 = arith.mulf %68, %69 : vector<8x1xf32>
    %cst_56 = arith.constant dense<0.000000e+00> : vector<4xf32>
    %71 = vector.multi_reduction <add>, %66, %cst_56 [1] : vector<4x64xf32> to vector<4xf32>
    %72 = vector.shape_cast %71 : vector<4xf32> to vector<4x1xf32>
    %cst_57 = arith.constant 1.562500e-02 : f32
    %73 = vector.broadcast %cst_57 : f32 to vector<4x1xf32>
    %74 = arith.mulf %72, %73 : vector<4x1xf32>
    %cst_58 = arith.constant dense<0.000000e+00> : vector<3x1xf32>
    %75 = tpu.matmul %5, %70, %cst_58 {dimension_numbers = #tpu.dot_dimension_numbers<[1], [0], [0], [1], [0, 0, 1, 1], [], []>} : vector<3x8xf32>, vector<8x1xf32>, vector<3x1xf32> -> vector<3x1xf32>
    %cst_59 = arith.constant dense<0.000000e+00> : vector<3x1xf32>
    %76 = tpu.matmul %6, %74, %cst_59 {dimension_numbers = #tpu.dot_dimension_numbers<[1], [0], [0], [1], [0, 0, 1, 1], [], []>} : vector<3x4xf32>, vector<4x1xf32>, vector<3x1xf32> -> vector<3x1xf32>
    %77 = arith.addf %75, %76 : vector<3x1xf32>
    %cst_60 = arith.constant 0.000000e+00 : f32
    %78 = vector.broadcast %cst_60 : f32 to vector<3x1xf32>
    %79 = arith.maximumf %77, %78 : vector<3x1xf32>
    %cst_61 = arith.constant dense<0.000000e+00> : vector<8x1xf32>
    %80 = tpu.matmul %7, %79, %cst_61 {dimension_numbers = #tpu.dot_dimension_numbers<[1], [0], [0], [1], [0, 0, 1, 1], [], []>} : vector<8x3xf32>, vector<3x1xf32>, vector<8x1xf32> -> vector<8x1xf32>
    %81 = arith.negf %80 : vector<8x1xf32>
    %82 = math.exp %81 : vector<8x1xf32>
    %cst_62 = arith.constant 1.000000e+00 : f32
    %83 = vector.broadcast %cst_62 : f32 to vector<8x1xf32>
    %84 = arith.addf %83, %82 : vector<8x1xf32>
    %85 = arith.divf %83, %84 : vector<8x1xf32>
    %cst_63 = arith.constant dense<0.000000e+00> : vector<4x1xf32>
    %86 = tpu.matmul %8, %79, %cst_63 {dimension_numbers = #tpu.dot_dimension_numbers<[1], [0], [0], [1], [0, 0, 1, 1], [], []>} : vector<4x3xf32>, vector<3x1xf32>, vector<4x1xf32> -> vector<4x1xf32>
    %87 = arith.negf %86 : vector<4x1xf32>
    %88 = math.exp %87 : vector<4x1xf32>
    %cst_64 = arith.constant 1.000000e+00 : f32
    %89 = vector.broadcast %cst_64 : f32 to vector<4x1xf32>
    %90 = arith.addf %89, %88 : vector<4x1xf32>
    %91 = arith.divf %89, %90 : vector<4x1xf32>
    %92 = vector.broadcast %85 : vector<8x1xf32> to vector<8x256xf32>
    %93 = arith.mulf %58, %92 : vector<8x256xf32>
    %94 = vector.broadcast %91 : vector<4x1xf32> to vector<4x64xf32>
    %95 = arith.mulf %66, %94 : vector<4x64xf32>
    %cst_65 = arith.constant dense<0.000000e+00> : vector<8x256xf32>
    %96 = tpu.matmul %9, %93, %cst_65 {dimension_numbers = #tpu.dot_dimension_numbers<[1], [0], [0], [1], [0, 0, 1, 1], [], []>} : vector<8x8xf32>, vector<8x256xf32>, vector<8x256xf32> -> vector<8x256xf32>
    %cst_66 = arith.constant dense<0.000000e+00> : vector<4x256xf32>
    %97 = tpu.matmul %95, %1, %cst_66 {dimension_numbers = #tpu.dot_dimension_numbers<[1], [0], [0], [1], [0, 0, 1, 1], [], []>} : vector<4x64xf32>, vector<64x256xf32>, vector<4x256xf32> -> vector<4x256xf32>
    %cst_67 = arith.constant dense<0.000000e+00> : vector<8x256xf32>
    %98 = tpu.matmul %10, %97, %cst_67 {dimension_numbers = #tpu.dot_dimension_numbers<[1], [0], [0], [1], [0, 0, 1, 1], [], []>} : vector<8x4xf32>, vector<4x256xf32>, vector<8x256xf32> -> vector<8x256xf32>
    %99 = arith.addf %96, %98 : vector<8x256xf32>
    %c1_68 = arith.constant 1 : index
    %c0_69 = arith.constant 0 : index
    %c0_70 = arith.constant 0 : index
    %100 = vector.load %arg13[%c1_68, %c0_69, %c0_70] : memref<2x8x256xf32, #tpu.memory_space<vmem>>, vector<1x8x256xf32>
    %101 = vector.shape_cast %100 : vector<1x8x256xf32> to vector<8x256xf32>
    %102 = vector.shape_cast %99 : vector<8x256xf32> to vector<1x8x256xf32>
    tpu.vector_store %arg13[%c1_68, %c0_69, %c0_70], %102 {strides = array<i32>} : memref<2x8x256xf32, #tpu.memory_space<vmem>>, vector<1x8x256xf32>,
    return
  }
  func.func @transform_0(%arg0: i32) -> (i32, i32, i32) {
    %c0_i32 = arith.constant 0 : i32
    %c0_i32_0 = arith.constant 0 : i32
    %c0_i32_1 = arith.constant 0 : i32
    return %arg0, %c0_i32, %c0_i32_0 : i32, i32, i32
  }
  func.func @transform_1(%arg0: i32) -> (i32, i32) {
    %c0_i32 = arith.constant 0 : i32
    %c0_i32_0 = arith.constant 0 : i32
    %c0_i32_1 = arith.constant 0 : i32
    return %c0_i32, %c0_i32_0 : i32, i32
  }
  func.func @transform_2(%arg0: i32) -> (i32, i32) {
    %c0_i32 = arith.constant 0 : i32
    %c0_i32_0 = arith.constant 0 : i32
    %c0_i32_1 = arith.constant 0 : i32
    return %c0_i32, %c0_i32_0 : i32, i32
  }
  func.func @transform_3(%arg0: i32) -> (i32, i32) {
    %c0_i32 = arith.constant 0 : i32
    %c0_i32_0 = arith.constant 0 : i32
    %c0_i32_1 = arith.constant 0 : i32
    return %c0_i32, %c0_i32_0 : i32, i32
  }
  func.func @transform_4(%arg0: i32) -> (i32, i32) {
    %c0_i32 = arith.constant 0 : i32
    %c0_i32_0 = arith.constant 0 : i32
    %c0_i32_1 = arith.constant 0 : i32
    return %c0_i32, %c0_i32_0 : i32, i32
  }
  func.func @transform_5(%arg0: i32) -> (i32, i32) {
    %c0_i32 = arith.constant 0 : i32
    %c0_i32_0 = arith.constant 0 : i32
    %c0_i32_1 = arith.constant 0 : i32
    return %c0_i32, %c0_i32_0 : i32, i32
  }
  func.func @transform_6(%arg0: i32) -> (i32, i32) {
    %c0_i32 = arith.constant 0 : i32
    %c0_i32_0 = arith.constant 0 : i32
    %c0_i32_1 = arith.constant 0 : i32
    return %c0_i32, %c0_i32_0 : i32, i32
  }
  func.func @transform_7(%arg0: i32) -> (i32, i32) {
    %c0_i32 = arith.constant 0 : i32
    %c0_i32_0 = arith.constant 0 : i32
    %c0_i32_1 = arith.constant 0 : i32
    return %c0_i32, %c0_i32_0 : i32, i32
  }
  func.func @transform_8(%arg0: i32) -> (i32, i32) {
    %c0_i32 = arith.constant 0 : i32
    %c0_i32_0 = arith.constant 0 : i32
    %c0_i32_1 = arith.constant 0 : i32
    return %c0_i32, %c0_i32_0 : i32, i32
  }
  func.func @transform_9(%arg0: i32) -> (i32, i32) {
    %c0_i32 = arith.constant 0 : i32
    %c0_i32_0 = arith.constant 0 : i32
    %c0_i32_1 = arith.constant 0 : i32
    return %c0_i32, %c0_i32_0 : i32, i32
  }
  func.func @transform_10(%arg0: i32) -> (i32, i32) {
    %c0_i32 = arith.constant 0 : i32
    %c0_i32_0 = arith.constant 0 : i32
    %c0_i32_1 = arith.constant 0 : i32
    return %c0_i32, %c0_i32_0 : i32, i32
  }
  func.func @transform_11(%arg0: i32) -> (i32, i32) {
    %c0_i32 = arith.constant 0 : i32
    %c0_i32_0 = arith.constant 0 : i32
    %c0_i32_1 = arith.constant 0 : i32
    return %c0_i32, %c0_i32_0 : i32, i32
  }
  func.func @transform_12(%arg0: i32) -> (i32, i32, i32) {
    %c0_i32 = arith.constant 0 : i32
    %c0_i32_0 = arith.constant 0 : i32
    %c0_i32_1 = arith.constant 0 : i32
    return %arg0, %c0_i32, %c0_i32_0 : i32, i32, i32
  }
}

</mosaic_0001>

<bundles_post_ra>
// kernel: tpu_custom_call.1
= control target key start
LH: loop header
LB: loop body
LE: loop exit
PB: predicated region body
PF: predicated region fallthrough
CT: control target
= control target key end

     0   :  { %s2195_s0 = inlined_call_operand.vmem [shape: f32[4,8,256], index: 0, kind: input, shape index: {}]   ;;  %s2196_s1 = inlined_call_operand.vmem [shape: f32[256,64], index: 1, kind: input, shape index: {}]   ;;  %s2197_s2 = inlined_call_operand.vmem [shape: f32[64,256], index: 2, kind: input, shape index: {}]   ;;  %s2198_s3 = inlined_call_operand.vmem [shape: f32[2,8], index: 3, kind: input, shape index: {}]   ;;  %s2199_s4 = inlined_call_operand.vmem [shape: f32[2,2], index: 4, kind: input, shape index: {}]   ;;  %s2200_s5 = inlined_call_operand.vmem [shape: f32[4,2], index: 5, kind: input, shape index: {}]   ;;  %s2201_s6 = inlined_call_operand.vmem [shape: f32[3,8], index: 6, kind: input, shape index: {}]   ;;  %s2202_s7 = inlined_call_operand.vmem [shape: f32[3,4], index: 7, kind: input, shape index: {}]   ;;  %s2203_s8 = inlined_call_operand.vmem [shape: f32[8,3], index: 8, kind: input, shape index: {}]   ;;  %s2204_s9 = inlined_call_operand.vmem [shape: f32[4,3], index: 9, kind: input, shape index: {}]   ;;  %s2205_s10 = inlined_call_operand.vmem [shape: f32[8,8], index: 10, kind: input, shape index: {}]   ;;  %s2206_s11 = inlined_call_operand.vmem [shape: f32[8,4], index: 11, kind: input, shape index: {}]   ;;  %s2207_s12 = inlined_call_operand.hbm [shape: f32[4,8,256], index: 12, kind: output, shape index: {}]  }
   0x1   :  { %2219 = sst [smem:[#allocation16_spill]] %s2195_s0 }
   0x2   :  { %17 = vsyncpa [#allocation3], 0 }
   0x3   :  { %19 = vsyncpa [#allocation3 + $0x1], 0  ;;  %s1623_s21 = smov 0   ;;  %s1625_s22 = smov 0  }
   0x4   :  { %s1627_s23 = smov 0   ;;  %s1629_s24 = smov 0  }
   0x5 LB: > { %s1644_s25 = sadd.s32 4294967295, %s1553_s24   ;;  %s1366_s26 = sadd.s32 4294967294, %s1553_s24   ;;  %s1553_s24 = sphi %s1629_s24, %s2250_s24   ;;  %s1549_s23 = sphi %s1627_s23, %s2249_s23   ;;  %s1545_s22 = sphi %s1625_s22, %s2248_s22   ;;  %s1541_s21 = sphi %s1623_s21, %s2247_s21  }
   0x6   : > { %s1648_s27 = sadd.s32 1, %s1553_s24   ;;  %s289_s28 = sadd.s32 1, %s1549_s23 }
   0x7   : > { %s286_s29 = ssub.s32 %s1553_s24, %s1648_s27  ;;  %p299_p0 = scmp.ne.s32.totalorder %s1549_s23, %s1545_s22 }
   0x8   : > { %p287_p1 = scmp.eq.s32.totalorder %s286_s29, 0  ;;  %p300_p2 = scmp.eq.s32.totalorder %s1644_s25, 1 }
   0x9   : > { %p305_p3 = scmp.ne.s32.totalorder %s1545_s22, %s1541_s21  ;;  %p306_p4 = scmp.eq.s32.totalorder %s1366_s26, 1 }
   0xa   : > { %s1659_s30 = scalar_select %p287_p1, %s1549_s23, %s289_s28  }
   0xb   : > { %p1661_p5 = por %p300_p2, %p299_p0  ;;  %p1665_p6 = por %p306_p4, %p305_p3 }
   0xc   : > { %2220 = sst [smem:[#allocation5_spill]] %s1659_s30  ;;  %p1369_p7 = scmp.ge.s32.totalorder %s1553_s24, 1 }
   0xd   : > { %p367_p8 = scmp.lt.s32.totalorder %s1553_s24, 3 }
   0xf   : > { %p368_p9 = pnand %p1369_p7, %p367_p8 }
  0x11   : > { %371 = sbr.rel (%p368_p9) target bundleno = 2612 (0xa34), region = 68 }
  0x16   : > { %v1674_v0 = vld [vmem:[%s2196_s1 + $0x78] sm:$0xff]  ;;  %v1684_v2 = vld [vmem:[%s2196_s1 + $0x70] sm:$0xff]  ;;  %v1696_v4 = vld [vmem:[%s2196_s1 + $0x68] sm:$0xff]  ;;  %s1371_s20 = sshll.u32 %s1644_s25, 1  ;;  %s2223_s0 = sld [smem:[#allocation16_spill]]  ;;  %vm597_vm0 = vcmask 523264  }
  0x17   : > { %v1679_v1 = vld [vmem:[%s2196_s1 + $0xf8] sm:$0xff]  ;;  %477 = vmatpush.msra.mxu0 %v1674_v0  ;;  %v1691_v3 = vld [vmem:[%s2196_s1 + $0xf0] sm:$0xff]  ;;  %v1701_v5 = vld [vmem:[%s2196_s1 + $0xe8] sm:$0xff]  ;;  %p411_p10 = scmp.lt.s32.totalorder %s1371_s20, 3  ;;  %vm517_vm1 = vcmask 64512   ;;  %vm546_vm2 = vcmask 1041408  }
  0x18   : > { %497 = vmatpush.msra.mxu1 %v1679_v1  ;;  %v1708_v6 = vld [vmem:[%s2196_s1 + $0x60] sm:$0xff]  ;;  %v1720_v8 = vld [vmem:[%s2196_s1 + $0x58] sm:$0xff]  ;;  %v1732_v10 = vld [vmem:[%s2196_s1 + $0x50] sm:$0xff]  ;;  %vm542_vm3 = vcmask 15360   ;;  %vm602_vm4 = vcmask 519168   ;;  %vm611_vm5 = vcmask 1043456  }
  0x19   : > { %478 = vmatpush.msra.mxu0 %v1684_v2  ;;  %v1713_v7 = vld [vmem:[%s2196_s1 + $0xe0] sm:$0xff]  ;;  %v1725_v9 = vld [vmem:[%s2196_s1 + $0xd8] sm:$0xff]  ;;  %v1737_v11 = vld [vmem:[%s2196_s1 + $0xd0] sm:$0xff]  ;;  %s2252_s20 = smov (!%p411_p10, %s1371_s20), 3  ;;  %vm607_vm6 = vcmask 31744   ;;  %vm663_vm7 = vcmask 1042432  }
  0x1a   : > { %498 = vmatpush.msra.mxu1 %v1691_v3  ;;  %v1744_v12 = vld [vmem:[%s2196_s1 + $0x48] sm:$0xff]  ;;  %v1756_v14 = vld [vmem:[%s2196_s1 + $0x40] sm:$0xff]  ;;  %v1769_v16 = vld [vmem:[%s2196_s1 + $0x38] sm:$0xff]  ;;  %s1428_s16 = sshll.u32 %s2252_s20, 4  ;;  %vm2218_vm8 = vcmask 23552   ;;  %v1555_v59 = vmov 0  }
  0x1b   : > { %479 = vmatpush.msra.mxu0 %v1696_v4  ;;  %v1749_v13 = vld [vmem:[%s2196_s1 + $0xc8] sm:$0xff]  ;;  %v1761_v15 = vld [vmem:[%s2196_s1 + $0xc0] sm:$0xff]  ;;  %v1774_v17 = vld [vmem:[%s2196_s1 + $0xb8] sm:$0xff]  ;;  %1473 = vset.pattern.permute.xlu1 %v1555_v59  ;;  %s1430_s26 = sshll.u32 %s1644_s25, 5 }
  0x1c   : > { %499 = vmatpush.msra.mxu1 %v1701_v5  ;;  %v1781_v18 = vld [vmem:[%s2196_s1 + $0x30] sm:$0xff]  ;;  %v1793_v20 = vld [vmem:[%s2196_s1 + $0x28] sm:$0xff]  ;;  %v1805_v22 = vld [vmem:[%s2196_s1 + $0x20] sm:$0xff]  ;;  %s1851_s30 = scalar_lea.vmem %s2223_s0, %s1428_s16  ;;  %1474 = vset.pattern.permute.xlu0 %v1555_v59  ;;  %s1300_s20 = scalar_lea.hbm %s2207_s12, %s1430_s26 }
  0x1d   : > { %480 = vmatpush.msra.mxu0 %v1708_v6  ;;  %v1786_v19 = vld [vmem:[%s2196_s1 + $0xb0] sm:$0xff]  ;;  %v1798_v21 = vld [vmem:[%s2196_s1 + $0xa8] sm:$0xff]  ;;  %v1810_v23 = vld [vmem:[%s2196_s1 + $0xa0] sm:$0xff]  ;;  %s1303_s15 = sshll.u32 %s1300_s20, 4  ;;  %s1511_s16 = scalar_lea.hbm %s2207_s12, 64  ;;  %s1304_s15 = int_to_ptr.hbm [resolvable:$true] %s1303_s15 }
  0x1e   : > { %500 = vmatpush.msra.mxu1 %v1713_v7  ;;  %v1817_v24 = vld [vmem:[%s2196_s1 + $0x18] sm:$0xff]  ;;  %v1829_v26 = vld [vmem:[%s2196_s1 + $0x10] sm:$0xff]  ;;  %v1841_v28 = vld [vmem:[%s2196_s1 + $0x8] sm:$0xff] }
  0x1f   : > { %481 = vmatpush.msra.mxu0 %v1720_v8  ;;  %v1822_v25 = vld [vmem:[%s2196_s1 + $0x98] sm:$0xff]  ;;  %v1834_v27 = vld [vmem:[%s2196_s1 + $0x90] sm:$0xff]  ;;  %v1846_v29 = vld [vmem:[%s2196_s1 + $0x88] sm:$0xff] }
  0x20   : > { %501 = vmatpush.msra.mxu1 %v1725_v9  ;;  %v1858_v30 = vld [vmem:[%s2196_s1] sm:$0xff]  ;;  %v1871_v33 = vld [vmem:[%s1851_s30 + $0x8] sm:$0xff] }
  0x21   : > { %482 = vmatpush.msra.mxu0 %v1732_v10  ;;  %v1863_v31 = vld [vmem:[%s2196_s1 + $0x80] sm:$0xff] }
  0x22   : > { %502 = vmatpush.msra.mxu1 %v1737_v11  ;;  %v1868_v32 = vld [vmem:[%s1851_s30] sm:$0xff] }
  0x23   : > { %483 = vmatpush.msra.mxu0 %v1744_v12  ;;  %v1880_v37 = vld [vmem:[%s2198_s3] sm:$0x3] }
  0x24   : > { %503 = vmatpush.msra.mxu1 %v1749_v13  ;;  %v1888_v41 = vld [vmem:[%s2199_s4] sm:$0x3] }
  0x25   : > { %484 = vmatpush.msra.mxu0 %v1756_v14  ;;  %v1896_v45 = vld [vmem:[%s2200_s5] sm:$0xf] }
  0x26   : > { %504 = vmatpush.msra.mxu1 %v1761_v15  ;;  %v1908_v49 = vld [vmem:[%s2201_s6] sm:$0x7] }
  0x27   : > { %485 = vmatpush.msra.mxu0 %v1769_v16  ;;  %2224 = vst [vmem:[#allocation6_spill] sm:$0xff] %v1908_v49  ;;  %v1915_v52 = vld [vmem:[%s2202_s7] sm:$0x7] }
  0x28   : > { %505 = vmatpush.msra.mxu1 %v1774_v17  ;;  %2225 = vst [vmem:[#allocation7_spill] sm:$0xff] %v1915_v52  ;;  %v1923_v57 = vld [vmem:[%s2204_s9] sm:$0xf] }
  0x29   : > { %486 = vmatpush.msra.mxu0 %v1781_v18  ;;  %2226 = vst [vmem:[#allocation8_spill] sm:$0xff] %v1923_v57  ;;  %v1928_v58 = vld [vmem:[%s2203_s8] sm:$0xff] }
  0x2a   : > { %506 = vmatpush.msra.mxu1 %v1786_v19  ;;  %2227 = vst [vmem:[#allocation9_spill] sm:$0xff] %v1928_v58 }
  0x2b   : > { %487 = vmatpush.msra.mxu0 %v1793_v20 }
  0x2c   : > { %507 = vmatpush.msra.mxu1 %v1798_v21 }
  0x2d   : > { %488 = vmatpush.msra.mxu0 %v1805_v22 }
  0x2e   : > { %508 = vmatpush.msra.mxu1 %v1810_v23 }
  0x2f   : > { %489 = vmatpush.msra.mxu0 %v1817_v24 }
  0x30   : > { %509 = vmatpush.msra.mxu1 %v1822_v25 }
  0x31   : > { %490 = vmatpush.msra.mxu0 %v1829_v26 }
  0x32   : > { %510 = vmatpush.msra.mxu1 %v1834_v27 }
  0x33   : > { %491 = vmatpush.msra.mxu0 %v1841_v28 }
  0x34   : > { %511 = vmatpush.msra.mxu1 %v1846_v29 }
  0x35   : > { %492 = vmatpush.msra.mxu0 %v1858_v30 }
  0x36   : > { %512 = vmatpush.msra.mxu1 %v1863_v31  ;;  %493 = vmatmul.f32.vlgmr.msra.gmra.mxu0 %v1868_v32 }
  0x37   : > { %513 = vmatmul.f32.vlgmr.msra.gmra.mxu1 %v1871_v33 }
  0xb3   : > { %v494_v34 = vpop.f32.mrf.mxu0 }
  0xb4   : > { %v514_v35 = vpop.f32.mrf.mxu1 }
  0xb5   : > { %v515_v36 = vadd.f32 %v514_v35, %v494_v34  ;;  %v1939_v34 = vld [vmem:[%s2197_s2 + $0x70] sm:$0xff]  ;;  %v1944_v35 = vld [vmem:[%s2197_s2 + $0x78] sm:$0xff] }
  0xb6   : > { %2228 = vst [vmem:[#allocation10_spill] sm:$0xff] %v1939_v34 }
  0xb7   : > { %536 = vmatpush.msra.mxu2 %v515_v36  ;;  %v598_v38 = vsel %vm597_vm0, %v515_v36, 0.0  ;;  %v1949_v36 = vld [vmem:[%s2197_s2 + $0x60] sm:$0xff] }
  0xb8   : > { %599 = vadd.xlane.f32.xlu0 %v598_v38  ;;  %1374 = vmatmul.msk.f32.vlgmr.msra.gmra.mxu2 %vm517_vm1, %v1880_v37  ;;  %2229 = vst [vmem:[#allocation11_spill] sm:$0xff] %v1949_v36  ;;  %v1956_v38 = vld [vmem:[%s2197_s2 + $0x68] sm:$0xff] }
 0x12b   : > { %v600_v42 = vpop.xlane.xlu0 %599 }
 0x12c   : > { %v601_v46 = vmul.f32 0.015625, %v600_v42 }
 0x13b   : > { %v538_v39 = vpop.f32.mrf.mxu2 }
 0x13c   : > { %v541_v40 = vmax.f32 %v538_v39, 0.0  ;;  %v1961_v39 = vld [vmem:[%s2197_s2 + $0x50] sm:$0xff] }
 0x13d   : > { %2230 = vst [vmem:[#allocation12_spill] sm:$0xff] %v1961_v39 }
 0x13e   : > { %1375 = vmatpush.msk.msra.mxu3 %vm546_vm2, %v541_v40  ;;  %v1966_v40 = vld [vmem:[%s2197_s2 + $0x58] sm:$0xff] }
 0x13f   : > { %1376 = vmatmul.msk.f32.vlgmr.msra.gmra.mxu3 %vm542_vm3, %v1888_v41 }
 0x1c2   : > { %v567_v43 = vpop.f32.mrf.mxu3 }
 0x1c3   : > { %v570_v44 = vmax.f32 %v567_v43, 0.0  ;;  %v1973_v43 = vld [vmem:[%s2197_s2 + $0x40] sm:$0xff] }
 0x1c4   : > { %2231 = vst [vmem:[#allocation13_spill] sm:$0xff] %v1973_v43 }
 0x1c5   : > { %1377 = vmatpush.msk.msrb.mxu2 %vm546_vm2, %v570_v44  ;;  %v1978_v44 = vld [vmem:[%s2197_s2 + $0x48] sm:$0xff] }
 0x1c6   : > { %1378 = vmatmul.msk.f32.vlgmr.msrb.gmra.mxu2 %vm542_vm3, %v1896_v45 }
 0x1c7   : > { %653 = vmatpush.msra.mxu2 %v601_v46 }
 0x1ce   : > { %1381 = vmatmul.msk.f32.vlgmr.msra.gmra.mxu2 %vm517_vm1, %v1908_v49 }
 0x249   : > { %v1901_v47 = vpop.f32.mrf.mxu2 }
 0x24a   : > { %v603_v48 = vsel %vm602_vm4, %v1901_v47, 0.0 }
 0x24b   : > { %604 = vadd.xlane.f32.xlu0 %v603_v48 }
 0x251   : > { %v655_v53 = vpop.f32.mrf.mxu2 }
 0x2be   : > { %v605_v50 = vpop.xlane.xlu0 %604 }
 0x2bf   : > { %v606_v51 = vmul.f32 0.015625, %v605_v50 }
 0x2c1   : > { %1379 = vmatpush.msk.msrb.mxu3 %vm611_vm5, %v606_v51  ;;  %v1985_v51 = vld [vmem:[%s2197_s2 + $0x30] sm:$0xff] }
 0x2c2   : > { %1380 = vmatmul.msk.f32.vlgmr.msrb.gmra.mxu3 %vm607_vm6, %v1915_v52  ;;  %2232 = vst [vmem:[#allocation14_spill] sm:$0xff] %v1985_v51 }
 0x345   : > { %v632_v54 = vpop.f32.mrf.mxu3 }
 0x346   : > { %v656_v55 = vadd.f32 %v655_v53, %v632_v54  ;;  %v1990_v53 = vld [vmem:[%s2197_s2 + $0x38] sm:$0xff]  ;;  %v1997_v54 = vld [vmem:[%s2197_s2 + $0x20] sm:$0xff] }
 0x347   : > { %2233 = vst [vmem:[#allocation15_spill] sm:$0xff] %v1997_v54 }
 0x348   : > { %v658_v56 = vmax.f32 %v656_v55, 0.0  ;;  %v2002_v55 = vld [vmem:[%s2197_s2 + $0x28] sm:$0xff] }
 0x34a   : > { %1382 = vmatpush.msk.msra.mxu3 %vm663_vm7, %v658_v56  ;;  %1385 = vmatpush.msk.msrb.mxu2 %vm663_vm7, %v658_v56  ;;  %v2009_v56 = vld [vmem:[%s2197_s2 + $0x18] sm:$0xff] }
 0x34b   : > { %1386 = vmatmul.msk.f32.vlgmr.msrb.gmra.mxu2 %vm2218_vm8, %v1923_v57  ;;  %1383 = vmatmul.msk.f32.vlgmr.msra.gmra.mxu3 %vm2218_vm8, %v1928_v58 }
 0x34c   : > { %772 = vmatpush.msrb.mxu3 %v1939_v34  ;;  %792 = vmatpush.msra.mxu2 %v1944_v35 }
 0x34e   : > { %773 = vmatpush.msrb.mxu3 %v1949_v36  ;;  %793 = vmatpush.msra.mxu2 %v1956_v38 }
 0x350   : > { %774 = vmatpush.msrb.mxu3 %v1961_v39  ;;  %794 = vmatpush.msra.mxu2 %v1966_v40 }
 0x352   : > { %775 = vmatpush.msrb.mxu3 %v1973_v43  ;;  %795 = vmatpush.msra.mxu2 %v1978_v44 }
 0x354   : > { %776 = vmatpush.msrb.mxu3 %v1985_v51  ;;  %796 = vmatpush.msra.mxu2 %v1990_v53 }
 0x356   : > { %777 = vmatpush.msrb.mxu3 %v1997_v54  ;;  %797 = vmatpush.msra.mxu2 %v2002_v55 }
 0x358   : > { %798 = vmatpush.msra.mxu2 %v2009_v56 }
 0x3ce   : > { %v726_v60 = vpop.f32.mrf.mxu2  ;;  %v684_v61 = vpop.f32.mrf.mxu3 }
 0x3cf   : > { %v1387_v62 = vmul.f32 -1.442695, %v726_v60  ;;  %v1384_v63 = vmul.f32 -1.442695, %v684_v61 }
 0x3d1   : > { %1475 = vpow2.f32 %v1387_v62 }
 0x3d2   : > { %1477 = vpow2.f32 %v1384_v63 }
 0x3d7   : > { %v1476_v42 = vpop.eup %1475 }
 0x3d8   : > { %v1478_v46 = vpop.eup %1477  ;;  %v732_v48 = vadd.f32 1.0, %v1476_v42 }
 0x3d9   : > { %v690_v50 = vadd.f32 1.0, %v1478_v46 }
 0x3da   : > { %1479 = vrcp.f32 %v732_v48  ;;  %v744_v42 = vand.u32 2147483648, %v732_v48  ;;  %v742_v43 = vand.u32 2147483647, %v732_v48  ;;  %vm738_vm10 = vweird.f32 %v732_v48 }
 0x3db   : > { %1481 = vrcp.f32 %v690_v50  ;;  %vm696_vm11 = vweird.f32 %v690_v50  ;;  %v702_v34 = vand.u32 2147483648, %v690_v50  ;;  %v700_v52 = vand.u32 2147483647, %v690_v50 }
 0x3dc   : > { %v745_v54 = vor.u32 1.1754944e-38, %v744_v42  ;;  %vm743_vm14 = vcmp.eq.f32.partialorder %v742_v43, 8.507059e+37 }
 0x3dd   : > { %vm701_vm8 = vcmp.eq.f32.partialorder %v700_v52, 8.507059e+37  ;;  %v2238_v52 = vld [vmem:[#allocation8_spill] sm:$0xff] }
 0x3e0   : > { %v1480_v59 = vpop.eup %1479 }
 0x3e1   : > { %v1482_v60 = vpop.eup %1481  ;;  %v734_v61 = vmul.f32 %v1480_v59, %v732_v48  ;;  %vm739_vm9 = vweird.f32 %v1480_v59  ;;  %v2017_v48 = vld [vmem:[%s2197_s2 + $0x10] sm:$0xff] }
 0x3e2   : > { %v692_v62 = vmul.f32 %v1482_v60, %v690_v50  ;;  %vm697_vm12 = vweird.f32 %v1482_v60  ;;  %vm740_vm13 = vmor %vm738_vm10, %vm739_vm9  ;;  %778 = vmatpush.msrb.mxu3 %v2017_v48 }
 0x3e3   : > { %v735_v63 = vsub.f32 1.0, %v734_v61  ;;  %vm698_vm15 = vmor %vm696_vm11, %vm697_vm12  ;;  %v703_v61 = vor.u32 1.1754944e-38, %v702_v34  ;;  %v2242_v34 = vld [vmem:[#allocation12_spill] sm:$0xff] }
 0x3e4   : > { %v693_v46 = vsub.f32 1.0, %v692_v62 }
 0x3e5   : > { %v736_v51 = vmul.f32 %v1480_v59, %v735_v63 }
 0x3e6   : > { %v694_v39 = vmul.f32 %v1482_v60, %v693_v46 }
 0x3e7   : > { %v737_v36 = vadd.f32 %v1480_v59, %v736_v51 }
 0x3e8   : > { %v695_v58 = vadd.f32 %v1482_v60, %v694_v39  ;;  %v2245_v39 = vld [vmem:[#allocation15_spill] sm:$0xff] }
 0x3e9   : > { %v741_v57 = vsel %vm740_vm13, %v1480_v59, %v737_v36  ;;  %v2023_v36 = vld [vmem:[%s2197_s2] sm:$0xff] }
 0x3ea   : > { %v746_v49 = vsel %vm743_vm14, %v745_v54, %v741_v57  ;;  %v699_v62 = vsel %vm698_vm15, %v1482_v60, %v695_v58  ;;  %779 = vmatpush.msrb.mxu3 %v2023_v36  ;;  %v2240_v57 = vld [vmem:[#allocation10_spill] sm:$0xff]  ;;  %v2241_v58 = vld [vmem:[#allocation11_spill] sm:$0xff] }
 0x3eb   : > { %757 = vperm.xlu1 %1473, %v746_v49   ;;  %v704_v63 = vsel %vm701_vm8, %v703_v61, %v699_v62  ;;  %v2028_v49 = vld [vmem:[%s2197_s2 + $0x8] sm:$0xff] }
 0x3ec   : > { %799 = vmatpush.msra.mxu2 %v2028_v49 }
 0x3ee   : > { %921 = vmatpush.msrb.mxu2 %v1679_v1 }
 0x3f0   : > { %922 = vmatpush.msrb.mxu2 %v1691_v3 }
 0x3f2   : > { %923 = vmatpush.msrb.mxu2 %v1701_v5 }
 0x3f3   : > { %750 = vperm.xlu1 %1473, %v704_v63  }
 0x3f4   : > { %924 = vmatpush.msrb.mxu2 %v1713_v7 }
 0x3f6   : > { %925 = vmatpush.msrb.mxu2 %v1725_v9  ;;  %v2055_v9 = vld [vmem:[%s2205_s10] sm:$0xff] }
 0x3f8   : > { %926 = vmatpush.msrb.mxu2 %v1737_v11  ;;  %v2060_v11 = vld [vmem:[%s1851_s30 + $0x18] sm:$0xff] }
 0x3fa   : > { %927 = vmatpush.msrb.mxu2 %v1749_v13 }
 0x3fc   : > { %928 = vmatpush.msrb.mxu2 %v1761_v15 }
 0x3fe   : > { %929 = vmatpush.msrb.mxu2 %v1774_v17 }
 0x400   : > { %930 = vmatpush.msrb.mxu2 %v1786_v19  ;;  %v2067_v19 = vld [vmem:[%s2206_s11] sm:$0xff] }
 0x402   : > { %931 = vmatpush.msrb.mxu2 %v1798_v21 }
 0x404   : > { %932 = vmatpush.msrb.mxu2 %v1810_v23 }
 0x406   : > { %933 = vmatpush.msrb.mxu2 %v1822_v25 }
 0x408   : > { %934 = vmatpush.msrb.mxu2 %v1834_v27  ;;  %v2234_v27 = vld [vmem:[#allocation6_spill] sm:$0xff] }
 0x40a   : > { %935 = vmatpush.msrb.mxu2 %v1846_v29 }
 0x40c   : > { %936 = vmatpush.msrb.mxu2 %v1863_v31 }
 0x45d   : > { %v758_v1 = vpop.permute.xlu1 %757 }
 0x45e   : > { %v760_v3 = vmul.f32 %v758_v1, %v1901_v47  ;;  %v2236_v47 = vld [vmem:[#allocation9_spill] sm:$0xff] }
 0x460   : > { %1388 = vmatmul.msk.f32.vlgmr.msrb.gmra.mxu3 %vm597_vm0, %v760_v3  ;;  %1389 = vmatmul.msk.f32.vlgmr.msra.gmra.mxu2 %vm597_vm0, %v760_v3 }
 0x465   : > { %v751_v5 = vpop.permute.xlu1 %750 }
 0x466   : > { %v753_v7 = vmul.f32 %v751_v5, %v1868_v32  ;;  %v754_v13 = vmul.f32 %v751_v5, %v1871_v33  ;;  %v2235_v32 = vld [vmem:[#allocation7_spill] sm:$0xff] }
 0x468   : > { %871 = vmatpush.msra.mxu3 %v753_v7  ;;  %937 = vmatmul.f32.vlgmr.msrb.gmra.mxu2 %v2060_v11 }
 0x469   : > { %1394 = vmatmul.msk.f32.vlgmr.msra.gmra.mxu3 %vm517_vm1, %v2055_v9 }
 0x4e3   : > { %v781_v15 = vpop.f32.mrf.mxu3  ;;  %v801_v17 = vpop.f32.mrf.mxu2 }
 0x4e4   : > { %1390 = vmatpush.msk.msrb.mxu0 %vm611_vm5, %v781_v15  ;;  %1392 = vmatpush.msk.msrb.mxu1 %vm611_vm5, %v801_v17 }
 0x4e5   : > { %1391 = vmatmul.msk.f32.vlgmr.msrb.gmra.mxu0 %vm607_vm6, %v2067_v19  ;;  %1393 = vmatmul.msk.f32.vlgmr.msrb.gmra.mxu1 %vm607_vm6, %v2067_v19 }
 0x4e6   : > { %891 = vmatpush.msra.mxu0 %v754_v13  ;;  %901 = vmatpush.msra.mxu1 %v1674_v0  ;;  %v2093_v0 = vld [vmem:[%s1851_s30 + $0x10] sm:$0xff]  ;;  %s407_s30 = sand.u32 1, %s1545_s22  }
 0x4e7   : > { %s1370_s18 = sshll.u32 %s407_s30, 5  ;;  %s1288_s17 = scalar_lea.sflag [#allocation3], %s407_s30 }
 0x4e8   : > { %902 = vmatpush.msra.mxu1 %v1684_v2  ;;  %s2108_s19 = scalar_lea.vmem [#allocation2], %s1370_s18  ;;  %s1505_s18 = sshra.s32 %s1304_s15, 4  ;;  %s1506_s18 = int_to_ptr.hbm [resolvable:$true] %s1505_s18 }
 0x4e9   : > { %s1301_s29 = sshll.u32 %s2108_s19, 4  ;;  %s1507_s25 = scalar_lea.hbm %s1506_s18, 32  ;;  %s1302_s29 = int_to_ptr.vmem [resolvable:$true] %s1301_s29 }
 0x4ea   : > { %903 = vmatpush.msra.mxu1 %v1696_v4  ;;  %p1508_p11 = scmp.ne.s32.totalorder %s1506_s18, %s1507_s25  ;;  %p1512_p0 = scmp.lt.s32.totalorder %s1506_s18, %s2207_s12 }
 0x4eb   : > { %p1513_p1 = scmp.lt.s32.totalorder %s1511_s16, %s1507_s25 }
 0x4ec   : > { %904 = vmatpush.msra.mxu1 %v1708_v6  ;;  %p1509_p12 = pnand %p1508_p11, %p1661_p5 }
 0x4ed   : > { %1395 = vmatmul.msk.f32.vlgmr.msra.gmra.mxu0 %vm517_vm1, %v2055_v9  ;;  %p1514_p2 = por %p1513_p1, %p1512_p0 }
 0x4ee   : > { %905 = vmatpush.msra.mxu1 %v1720_v8  ;;  %p1510_p13 = pneg %p1509_p12 }
 0x4f0   : > { %906 = vmatpush.msra.mxu1 %v1732_v10  ;;  %v938_v10 = vpop.f32.mrf.mxu2  ;;  %p1515_p3 = pnand %p1514_p2, %p1510_p13 }
 0x4f2   : > { %907 = vmatpush.msra.mxu1 %v1744_v12 }
 0x4f4   : > { %908 = vmatpush.msra.mxu1 %v1756_v14 }
 0x4f6   : > { %909 = vmatpush.msra.mxu1 %v1769_v16 }
 0x4f8   : > { %910 = vmatpush.msra.mxu1 %v1781_v18  ;;  %v873_v18 = vpop.f32.mrf.mxu3 }
 0x4fa   : > { %911 = vmatpush.msra.mxu1 %v1793_v20 }
 0x4fc   : > { %912 = vmatpush.msra.mxu1 %v1805_v22 }
 0x4fe   : > { %913 = vmatpush.msra.mxu1 %v1817_v24 }
 0x500   : > { %914 = vmatpush.msra.mxu1 %v1829_v26 }
 0x502   : > { %915 = vmatpush.msra.mxu1 %v1841_v28 }
 0x504   : > { %916 = vmatpush.msra.mxu1 %v1858_v30 }
 0x505   : > { %917 = vmatmul.f32.vlgmr.msra.gmra.mxu1 %v2093_v0 }
 0x506   : > { %1186 = vmatpush.msrb.mxu1 %v1944_v35  ;;  %v2243_v35 = vld [vmem:[#allocation13_spill] sm:$0xff] }
 0x508   : > { %1187 = vmatpush.msrb.mxu1 %v1956_v38  ;;  %v2244_v38 = vld [vmem:[#allocation14_spill] sm:$0xff] }
 0x50a   : > { %1188 = vmatpush.msrb.mxu1 %v1966_v40 }
 0x50c   : > { %1189 = vmatpush.msrb.mxu1 %v1978_v44 }
 0x50e   : > { %1190 = vmatpush.msrb.mxu1 %v1990_v53 }
 0x510   : > { %1191 = vmatpush.msrb.mxu1 %v2002_v55 }
 0x512   : > { %1192 = vmatpush.msrb.mxu1 %v2009_v56 }
 0x514   : > { %1193 = vmatpush.msrb.mxu1 %v2028_v49 }
 0x562   : > { %v830_v2 = vpop.f32.mrf.mxu0  ;;  %v850_v4 = vpop.f32.mrf.mxu1 }
 0x563   : > { %v874_v20 = vadd.f32 %v873_v18, %v830_v2 }
 0x565   : > { %896 = vst [vmem:[%s2108_s19] sm:$0xff] %v874_v20 }
 0x56a   : > { %v893_v6 = vpop.f32.mrf.mxu0 }
 0x56b   : > { %v894_v8 = vadd.f32 %v893_v6, %v850_v4 }
 0x56d   : > { %897 = vst [vmem:[%s2108_s19 + $0x8] sm:$0xff] %v894_v8 }
 0x582   : > { %v918_v12 = vpop.f32.mrf.mxu1 }
 0x583   : > { %v939_v14 = vadd.f32 %v938_v10, %v918_v12 }
 0x585   : > { %956 = vmatpush.msrb.mxu3 %v939_v14  ;;  %v1009_v16 = vsel %vm597_vm0, %v939_v14, 0.0 }
 0x586   : > { %1010 = vadd.xlane.f32.xlu2 %v1009_v16  ;;  %1398 = vmatmul.msk.f32.vlgmr.msrb.gmra.mxu3 %vm517_vm1, %v1880_v37 }
 0x5f9   : > { %v1011_v23 = vpop.xlane.xlu2 %1010 }
 0x5fa   : > { %v1012_v26 = vmul.f32 0.015625, %v1011_v23 }
 0x609   : > { %v958_v21 = vpop.f32.mrf.mxu3 }
 0x60a   : > { %v961_v22 = vmax.f32 %v958_v21, 0.0 }
 0x60c   : > { %1399 = vmatpush.msk.msrb.mxu0 %vm546_vm2, %v961_v22 }
 0x60d   : > { %1400 = vmatmul.msk.f32.vlgmr.msrb.gmra.mxu0 %vm542_vm3, %v1888_v41 }
 0x68a   : > { %v982_v24 = vpop.f32.mrf.mxu0 }
 0x68b   : > { %v985_v25 = vmax.f32 %v982_v24, 0.0 }
 0x68d   : > { %1401 = vmatpush.msk.msra.mxu3 %vm546_vm2, %v985_v25  ;;  %vm2237_vm2 = vcmask 23552  }
 0x68e   : > { %1402 = vmatmul.msk.f32.vlgmr.msra.gmra.mxu3 %vm542_vm3, %v1896_v45  ;;  %vm2239_vm3 = vmmov %vm2237_vm2 }
 0x68f   : > { %1055 = vmatpush.msrb.mxu3 %v1012_v26 }
 0x696   : > { %1405 = vmatmul.msk.f32.vlgmr.msrb.gmra.mxu3 %vm517_vm1, %v2234_v27 }
 0x711   : > { %v2123_v28 = vpop.f32.mrf.mxu3 }
 0x712   : > { %v1013_v29 = vsel %vm602_vm4, %v2123_v28, 0.0 }
 0x713   : > { %1014 = vadd.xlane.f32.xlu2 %v1013_v29 }
 0x719   : > { %v1057_v33 = vpop.f32.mrf.mxu3 }
 0x786   : > { %v1015_v30 = vpop.xlane.xlu2 %1014 }
 0x787   : > { %v1016_v31 = vmul.f32 0.015625, %v1015_v30 }
 0x789   : > { %1403 = vmatpush.msk.msra.mxu0 %vm611_vm5, %v1016_v31 }
 0x78a   : > { %1404 = vmatmul.msk.f32.vlgmr.msra.gmra.mxu0 %vm607_vm6, %v2235_v32 }
 0x807   : > { %v1037_v37 = vpop.f32.mrf.mxu0 }
 0x808   : > { %v1058_v41 = vadd.f32 %v1057_v33, %v1037_v37 }
 0x80a   : > { %v1060_v45 = vmax.f32 %v1058_v41, 0.0 }
 0x80c   : > { %1406 = vmatpush.msk.msrb.mxu0 %vm663_vm7, %v1060_v45  ;;  %1409 = vmatpush.msk.msra.mxu3 %vm663_vm7, %v1060_v45 }
 0x80d   : > { %1407 = vmatmul.msk.f32.vlgmr.msrb.gmra.mxu0 %vm2237_vm2, %v2236_v47  ;;  %1410 = vmatmul.msk.f32.vlgmr.msra.gmra.mxu3 %vm2239_vm3, %v2238_v52 }
 0x80e   : > { %1166 = vmatpush.msra.mxu0 %v2240_v57 }
 0x810   : > { %1167 = vmatpush.msra.mxu0 %v2241_v58 }
 0x812   : > { %1168 = vmatpush.msra.mxu0 %v2242_v34 }
 0x814   : > { %1169 = vmatpush.msra.mxu0 %v2243_v35 }
 0x816   : > { %1170 = vmatpush.msra.mxu0 %v2244_v38 }
 0x818   : > { %1171 = vmatpush.msra.mxu0 %v2245_v39 }
 0x81a   : > { %1172 = vmatpush.msra.mxu0 %v2017_v48 }
 0x81c   : > { %1173 = vmatpush.msra.mxu0 %v2023_v36 }
 0x88a   : > { %v1081_v40 = vpop.f32.mrf.mxu0 }
 0x88b   : > { %v1408_v43 = vmul.f32 -1.442695, %v1081_v40 }
 0x88d   : > { %1483 = vpow2.f32 %v1408_v43 }
 0x890   : > { %v1120_v44 = vpop.f32.mrf.mxu3 }
 0x891   : > { %v1411_v50 = vmul.f32 -1.442695, %v1120_v44 }
 0x893   : > { %v1484_v51 = vpop.eup %1483  ;;  %1485 = vpow2.f32 %v1411_v50 }
 0x894   : > { %v1087_v53 = vadd.f32 1.0, %v1484_v51 }
 0x896   : > { %1487 = vrcp.f32 %v1087_v53  ;;  %v1099_v60 = vand.u32 2147483648, %v1087_v53  ;;  %vm1093_vm4 = vweird.f32 %v1087_v53  ;;  %v1097_v46 = vand.u32 2147483647, %v1087_v53 }
 0x898   : > { %v1100_v63 = vor.u32 1.1754944e-38, %v1099_v60  ;;  %vm1098_vm9 = vcmp.eq.f32.partialorder %v1097_v46, 8.507059e+37 }
 0x899   : > { %v1486_v54 = vpop.eup %1485 }
 0x89a   : > { %v1126_v55 = vadd.f32 1.0, %v1486_v54 }
 0x89c   : > { %v1488_v56 = vpop.eup %1487  ;;  %1489 = vrcp.f32 %v1126_v55  ;;  %v1138_v5 = vand.u32 2147483648, %v1126_v55  ;;  %v1136_v13 = vand.u32 2147483647, %v1126_v55  ;;  %vm1132_vm11 = vweird.f32 %v1126_v55 }
 0x89d   : > { %v1089_v59 = vmul.f32 %v1488_v56, %v1087_v53  ;;  %vm1094_vm7 = vweird.f32 %v1488_v56 }
 0x89e   : > { %vm1095_vm8 = vmor %vm1093_vm4, %vm1094_vm7  ;;  %v1139_v17 = vor.u32 1.1754944e-38, %v1138_v5  ;;  %vm1137_vm13 = vcmp.eq.f32.partialorder %v1136_v13, 8.507059e+37 }
 0x89f   : > { %v1090_v42 = vsub.f32 1.0, %v1089_v59 }
 0x8a1   : > { %v1091_v61 = vmul.f32 %v1488_v56, %v1090_v42 }
 0x8a2   : > { %v1490_v62 = vpop.eup %1489 }
 0x8a3   : > { %v1092_v48 = vadd.f32 %v1488_v56, %v1091_v61  ;;  %v1128_v36 = vmul.f32 %v1490_v62, %v1126_v55  ;;  %vm1133_vm10 = vweird.f32 %v1490_v62 }
 0x8a4   : > { %vm1134_vm12 = vmor %vm1132_vm11, %vm1133_vm10 }
 0x8a5   : > { %v1096_v49 = vsel %vm1095_vm8, %v1488_v56, %v1092_v48  ;;  %v1129_v1 = vsub.f32 1.0, %v1128_v36 }
 0x8a6   : > { %v1101_v3 = vsel %vm1098_vm9, %v1100_v63, %v1096_v49 }
 0x8a7   : > { %1144 = vperm.xlu1 %1473, %v1101_v3   ;;  %v1130_v7 = vmul.f32 %v1490_v62, %v1129_v1 }
 0x8a9   : > { %v1131_v15 = vadd.f32 %v1490_v62, %v1130_v7 }
 0x8ab   : > { %v1135_v2 = vsel %vm1134_vm12, %v1490_v62, %v1131_v15 }
 0x8ac   : > { %v1140_v4 = vsel %vm1137_vm13, %v1139_v17, %v1135_v2 }
 0x8ad   : > { %1151 = vperm.xlu0 %1474, %v1140_v4  }
 0x919   : > { %v1145_v10 = vpop.permute.xlu1 %1144 }
 0x91a   : > { %v1147_v16 = vmul.f32 %v2093_v0, %v1145_v10  ;;  %v1148_v18 = vmul.f32 %v2060_v11, %v1145_v10 }
 0x91f   : > { %v1152_v6 = vpop.permute.xlu0 %1151 }
 0x920   : > { %v1154_v8 = vmul.f32 %v1152_v6, %v2123_v28 }
 0x922   : > { %1412 = vmatmul.msk.f32.vlgmr.msra.gmra.mxu0 %vm597_vm0, %v1154_v8  ;;  %1413 = vmatmul.msk.f32.vlgmr.msrb.gmra.mxu1 %vm597_vm0, %v1154_v8 }
 0x99f   : > { %v1175_v12 = vpop.f32.mrf.mxu0  ;;  %v1195_v14 = vpop.f32.mrf.mxu1 }
 0x9a0   : > { %1414 = vmatpush.msk.msra.mxu2 %vm611_vm5, %v1175_v12  ;;  %1416 = vmatpush.msk.msrb.mxu3 %vm611_vm5, %v1195_v14 }
 0x9a1   : > { %1415 = vmatmul.msk.f32.vlgmr.msra.gmra.mxu2 %vm607_vm6, %v2067_v19  ;;  %1417 = vmatmul.msk.f32.vlgmr.msrb.gmra.mxu3 %vm607_vm6, %v2067_v19 }
 0x9a2   : > { %1259 = vmatpush.msrb.mxu2 %v1147_v16  ;;  %1279 = vmatpush.msra.mxu3 %v1148_v18 }
 0x9a9   : > { %1418 = vmatmul.msk.f32.vlgmr.msrb.gmra.mxu2 %vm517_vm1, %v2055_v9  ;;  %1419 = vmatmul.msk.f32.vlgmr.msra.gmra.mxu3 %vm517_vm1, %v2055_v9 }
 0xa24   : > { %v1221_v11 = vpop.f32.mrf.mxu2  ;;  %v1241_v0 = vpop.f32.mrf.mxu3 }
 0xa2c   : > { %v1261_v19 = vpop.f32.mrf.mxu2  ;;  %v1281_v20 = vpop.f32.mrf.mxu3 }
 0xa2d   : > { %v1262_v21 = vadd.f32 %v1261_v19, %v1221_v11  ;;  %v1282_v22 = vadd.f32 %v1281_v20, %v1241_v0 }
 0xa2f   : > { %1420 = vst [vmem:[%s2108_s19 + $0x10] sm:$0xff] %v1262_v21 }
 0xa30   : > { %1421 = vst [vmem:[%s2108_s19 + $0x18] sm:$0xff] %v1282_v22 }
 0xa31   : > { %1518 = shalt.err (!%p1515_p3)
}
 0xa32   : > { %s1556_s30 = smov 256   ;;  %s1557_s19 = smov 16  }
 0xa33   : > { %1431 = dma.vmem_to_hbm [thread:$0]  (%p1661_p5), %s1302_s29, 512, %s1304_s15, %s1288_s17, %s1556_s30, %s1556_s30, %s1557_s19  }
 0xa34 PF: > { %p1437_p4 = scmp.ge.s32.totalorder %s1553_s24, 2  ;;  %s1318_s26 = sand.u32 1, %s1541_s21  }
 0xa35   : > { %s1319_s0 = scalar_lea.sflag [#allocation3], %s1318_s26 }
 0xa36   : > { %p1434_p7 = pnand %p1437_p4, %p1665_p6 }
 0xa38   : > { %p1435_p8 = pneg %p1434_p7 }
 0xa3a   : > { %1536 = dma.done.wait (%p1435_p8), %s1319_s0, 512  }
 0xa3b   : > { %1538 = vsyncadd (%p1435_p8), %s1319_s0, 4294966784  ;;  %s2246_s18 = sld [smem:[#allocation5_spill]]  ;;  %p22_p9 = scmp.ge.s32.totalorder %s1648_s27, 4  }
 0xa3c   : > { %s2247_s21 = smov %s1545_s22  ;;  %s2248_s22 = smov %s1549_s23 }
 0xa3d   : > { %s2250_s24 = smov %s1648_s27  ;;  %24 = sbr.rel (!%p22_p9) target bundleno = 5 (0x5), region = 105 }
 0xa41   : > { %s2249_s23 = smov %s2246_s18 }
 0xa42   :  { %1325 = vsyncpa [#allocation3], 1 }
 0xa43   :  { %1327 = vsyncpa [#allocation3 + $0x1], 1 }

</bundles_post_ra>
